<compile_context>
chip_gen: v7x
topology: tpu7x:2x2x1
jax: 0.10.0
libtpu: 0.0.40
codegen_flags: <defaults>
</compile_context>

<pallas_src>
import functools
import numpy as np

import jax
import jax.numpy as jnp
from jax.experimental import pallas as pl
from jax.experimental.pallas import tpu as pltpu


def pos_table(n_embeddings, hidden_size):
    """Positional-encoding table, identical math to the PyTorch reference."""
    def get_angle(x, h):
        return x / np.power(10000, 2 * (h // 2) / hidden_size)
    tab = np.array(
        [[get_angle(i, j) for j in range(hidden_size)] for i in range(n_embeddings)],
        dtype=np.float64)
    tab[:, 0::2] = np.sin(tab[:, 0::2])
    tab[:, 1::2] = np.cos(tab[:, 1::2])
    return jnp.asarray(tab, dtype=jnp.float32)


def _attention_neuron_kernel(pa_ref, obs_ref, h_in_ref, c_in_ref, w_ref,
                             attn_ref, h_ref, c_ref):
    """One timestep of the AttentionNeuron recurrence (grid axis 0 = time).

    h_ref / c_ref have a constant index_map, so they stay VMEM-resident across the grid
    and carry the LSTM state; they are initialized from the (aliased) inputs at t == 0.
    Layout: feature axis N (padded to NPAD=128) on lanes; state is column-major (H, NPAD)
    so gate splits are sublane-aligned and all big stores are lane-dense.
    """
    t = pl.program_id(0)
    H = h_ref.shape[0]
    E = attn_ref.shape[0]

    @pl.when(t == 0)
    def _():
        h_ref[...] = h_in_ref[...]
        c_ref[...] = c_in_ref[...]

    prev_action = pa_ref[t]                          # SMEM scalar for this step
    obs_row = obs_ref[...]                           # (1, NPAD), zero-padded lanes
    h = h_ref[...]                                   # (H, NPAD)  carried state
    c = c_ref[...]                                   # (H, NPAD)

    # Packed constants: [ W_hh (4H,H) ; A=(Q Wq^T) Wk (E,H) ; aux (4H,3) zero-padded ]
    w_hh = w_ref[0:4 * H, 0:H]                       # (4H, H)
    a_mat = w_ref[4 * H:4 * H + E, 0:H]              # (E, H)
    aux = w_ref[4 * H + E:8 * H + E, 0:3]            # (4H, 3) = [W_ih[:,0] | W_ih[:,1] | b_ih+b_hh]
    w_ih_obs = aux[:, 0:1]
    w_ih_act = aux[:, 1:2]
    bias = aux[:, 2:3]

    # gates[:, j] = W_ih @ [obs_j, prev_action] + W_hh @ h_j + (b_ih + b_hh)
    gates = (
        jnp.dot(w_hh, h, preferred_element_type=jnp.float32)     # (4H, NPAD)
        + w_ih_obs * obs_row
        + w_ih_act * prev_action
        + bias
    )

    def sigmoid(z):                                  # single EUP tanh, no exp + divide
        return 0.5 * jnp.tanh(0.5 * z) + 0.5

    i_g = sigmoid(gates[0 * H:1 * H, :])
    f_g = sigmoid(gates[1 * H:2 * H, :])
    g_g = jnp.tanh(gates[2 * H:3 * H, :])
    o_g = sigmoid(gates[3 * H:4 * H, :])

    c_new = f_g * c + i_g * g_g                      # (H, NPAD)
    h_new = o_g * jnp.tanh(c_new)                    # (H, NPAD)

    # attn = tanh( (Q Wq^T Wk) @ h_new )  -- scale=False => no /sqrt(proj_dim)
    attn_ref[...] = jnp.tanh(
        jnp.dot(a_mat, h_new, preferred_element_type=jnp.float32))      # (E, NPAD)
    h_ref[...] = h_new
    c_ref[...] = c_new


def prepare_params(raw, n_embeddings, hidden_size):
    """One-time layout prep (hoisted out of the per-call path)."""
    H, E = hidden_size, n_embeddings
    hp = jax.lax.Precision.HIGHEST
    q_tab = pos_table(E, H)                                               # (E, H)
    # Fold the two attention projections into a single (E, H) matrix.
    a_mat = jnp.dot(jnp.dot(q_tab, raw["wq"].T, precision=hp),
                    raw["wk"], precision=hp)                              # (E, H)
    aux = jnp.concatenate(
        [raw["w_ih"][:, 0:1],
         raw["w_ih"][:, 1:2],
         (raw["b_ih"] + raw["b_hh"])[:, None]], axis=1)                   # (4H, 3)
    width = max(H, 3)
    pad = lambda m: jnp.pad(m, ((0, 0), (0, width - m.shape[1])))
    # Single packed constant operand: rows [0,4H)=W_hh, [4H,4H+E)=A, [4H+E,8H+E)=aux.
    w_all = jnp.concatenate([pad(raw["w_hh"]), pad(a_mat), pad(aux)], axis=0)
    return {"w_all": w_all}


@functools.partial(jax.jit, donate_argnums=(3, 4))
def attention_neuron_rollout(obs_seq, prev_actions, prep, h, c):
    """Run T recurrent AttentionNeuron steps in one kernel launch.

    obs_seq: (T, N) f32, prev_actions: (T,) f32, h/c: (H, NPAD) carried state (donated).
    Returns (latent (T, E), attn (T, E, N), h_new, c_new).
    """
    T, n_features = obs_seq.shape
    H, npad = h.shape
    w_all = prep["w_all"]
    E = w_all.shape[0] - 8 * H

    obs_pad = jnp.pad(obs_seq.astype(jnp.float32),
                      ((0, 0), (0, npad - n_features)))                   # (T, NPAD)
    obs_in = obs_pad[:, None, :]                                          # (T, 1, NPAD)
    pa = prev_actions.astype(jnp.float32)                                 # (T,)

    vmem_state = pl.BlockSpec((H, npad), lambda t: (0, 0))                # resident block

    attn_full, h_new, c_new = pl.pallas_call(
        _attention_neuron_kernel,
        grid=(T,),
        out_shape=(
            jax.ShapeDtypeStruct((T, E, npad), jnp.float32),
            jax.ShapeDtypeStruct((H, npad), jnp.float32),
            jax.ShapeDtypeStruct((H, npad), jnp.float32),
        ),
        in_specs=[
            pl.BlockSpec(memory_space=pltpu.MemorySpace.SMEM),            # prev_actions
            pl.BlockSpec((None, 1, npad), lambda t: (t, 0, 0)),           # obs (per step)
            vmem_state,                                                   # h_in (read @ t==0)
            vmem_state,                                                   # c_in (read @ t==0)
            pl.BlockSpec(w_all.shape, lambda t: (0, 0)),                  # packed constants
        ],
        out_specs=(
            pl.BlockSpec((None, E, npad), lambda t: (t, 0, 0)),           # attn per step
            vmem_state,                                                   # h carried / out
            vmem_state,                                                   # c carried / out
        ),
        input_output_aliases={2: 1, 3: 2},                                # h->h_out, c->c_out
        compiler_params=pltpu.CompilerParams(dimension_semantics=("arbitrary",)),
    )(pa, obs_in, h, c, w_all)

    # latent = tanh(attn @ obs): VPU multiply + reduce over the lane-dense attn output.
    # Padded obs lanes are zero, so the garbage attn lanes contribute nothing.
    latent = jnp.tanh(jnp.sum(attn_full * obs_pad[:, None, :], axis=-1))  # (T, E)
    return latent, attn_full[:, :, :n_features], h_new, c_new


def init_params(key, hidden_size, proj_dim):
    """PyTorch-style uniform init for LSTMCell(2, H) and Linear(H, P, bias=False)."""
    ks = jax.random.split(key, 6)
    b = 1.0 / float(np.sqrt(hidden_size))
    return {
        "w_ih": jax.random.uniform(ks[0], (4 * hidden_size, 2), jnp.float32, -b, b),
        "w_hh": jax.random.uniform(ks[1], (4 * hidden_size, hidden_size), jnp.float32, -b, b),
        "b_ih": jax.random.uniform(ks[2], (4 * hidden_size,), jnp.float32, -b, b),
        "b_hh": jax.random.uniform(ks[3], (4 * hidden_size,), jnp.float32, -b, b),
        "wq": jax.random.uniform(ks[4], (proj_dim, hidden_size), jnp.float32, -b, b),
        "wk": jax.random.uniform(ks[5], (proj_dim, hidden_size), jnp.float32, -b, b),
    }


def attention_neuron_ref(obs, prev_action, raw, q_tab, h, c):
    """Pure-JAX mirror of the PyTorch forward pass (h, c row-major: (N, H)), unfolded weights."""
    H = h.shape[1]
    n = obs.shape[0]
    hp = jax.lax.Precision.HIGHEST
    x = jnp.stack([obs, jnp.full((n,), prev_action, jnp.float32)], axis=-1)   # (N, 2)
    gates = (jnp.dot(x, raw["w_ih"].T, precision=hp)
             + jnp.dot(h, raw["w_hh"].T, precision=hp)
             + raw["b_ih"] + raw["b_hh"])                                     # (N, 4H)
    sig = lambda z: 1.0 / (1.0 + jnp.exp(-z))
    i = sig(gates[:, 0:H]); f = sig(gates[:, H:2 * H])
    g = jnp.tanh(gates[:, 2 * H:3 * H]); o = sig(gates[:, 3 * H:4 * H])
    c_new = f * c + i * g
    h_new = o * jnp.tanh(c_new)
    q = jnp.dot(q_tab, raw["wq"].T, precision=hp)                             # (E, P)
    k = jnp.dot(h_new, raw["wk"].T, precision=hp)                             # (N, P)
    attn = jnp.tanh(jnp.dot(q, k.T, precision=hp))                            # (E, N), scale=False
    latent = jnp.tanh(jnp.dot(attn, obs[:, None], precision=hp))[:, 0]        # (E,)
    return latent, attn, h_new, c_new


if __name__ == "__main__":
    n_features = 32
    n_embeddings = 16
    proj_dim = 32
    hidden_size = 8
    T = 4
    npad = 128   # feature axis padded onto 128 lanes

    key = jax.random.PRNGKey(0)
    key, kp, ko, ka = jax.random.split(key, 4)
    raw = init_params(kp, hidden_size, proj_dim)
    q_tab = pos_table(n_embeddings, hidden_size)
    prep = prepare_params(raw, n_embeddings, hidden_size)

    obs_all = jax.random.normal(ko, (2 * T, n_features), jnp.float32)
    act_all = jax.random.uniform(ka, (2 * T,), jnp.float32, minval=-1.0, maxval=1.0)

    # Pallas: two rollout segments (exercises the in-kernel recurrence AND the aliased
    # state handoff between calls).
    h = jnp.zeros((hidden_size, npad), jnp.float32)
    c = jnp.zeros((hidden_size, npad), jnp.float32)
    lat1, attn1, h, c = attention_neuron_rollout(obs_all[:T], act_all[:T], prep, h, c)
    lat2, attn2, h, c = attention_neuron_rollout(obs_all[T:], act_all[T:], prep, h, c)
    lat2 = jax.block_until_ready(lat2)
    lat = jnp.concatenate([lat1, lat2], axis=0)
    attn = jnp.concatenate([attn1, attn2], axis=0)

    # Reference: same 2T steps, step by step, with the unfolded weights.
    hr = jnp.zeros((n_features, hidden_size), jnp.float32)
    cr = jnp.zeros((n_features, hidden_size), jnp.float32)
    rlat, rattn = [], []
    for t in range(2 * T):
        l_t, a_t, hr, cr = attention_neuron_ref(obs_all[t], float(act_all[t]), raw, q_tab, hr, cr)
        rlat.append(l_t); rattn.append(a_t)
    rlat = jnp.stack(rlat); rattn = jnp.stack(rattn)

    assert lat.shape == (2 * T, n_embeddings)
    assert attn.shape == (2 * T, n_embeddings, n_features)
    checks = [(lat, rlat), (attn, rattn),
              (h[:, :n_features].T, hr), (c[:, :n_features].T, cr)]
    for got, want in checks:
        assert jnp.allclose(got, want, atol=1e-4, rtol=1e-4), (got, want)
    assert bool(jnp.all(jnp.abs(lat) <= 1.0)) and bool(jnp.all(jnp.abs(attn) <= 1.0))

    print("KERNEL_OK")
</pallas_src>

<mosaic_0001>
module attributes {stable_mosaic.version = 11 : i64} {
  func.func @_attention_neuron_kernel(%arg0: i32, %arg1: memref<4xf32, #tpu.memory_space<smem>>, %arg2: memref<1x1x128xf32, #tpu.memory_space<vmem>>, %arg3: memref<8x128xf32, #tpu.memory_space<vmem>>, %arg4: memref<8x128xf32, #tpu.memory_space<vmem>>, %arg5: memref<80x8xf32, #tpu.memory_space<vmem>>, %arg6: memref<1x16x128xf32, #tpu.memory_space<vmem>>, %arg7: memref<8x128xf32, #tpu.memory_space<vmem>>, %arg8: memref<8x128xf32, #tpu.memory_space<vmem>>) attributes {dimension_semantics = [#tpu.dimension_semantics<arbitrary>], iteration_bounds = array<i64: 4>, scalar_prefetch = 0 : i64, scratch_operands = 0 : i64, tpu.core_type = #tpu.core_type<tc>, window_params = [{transform_indices = @transform_0, window_bounds = array<i64: 4>}, {transform_indices = @transform_1, window_bounds = array<i64: 1, 1, 128>}, {pipeline_mode = #tpu.pipeline_mode<synchronous>, transform_indices = @transform_2, window_bounds = array<i64: 8, 128>}, {pipeline_mode = #tpu.pipeline_mode<synchronous>, transform_indices = @transform_3, window_bounds = array<i64: 8, 128>}, {pipeline_mode = #tpu.pipeline_mode<synchronous>, transform_indices = @transform_4, window_bounds = array<i64: 80, 8>}, {transform_indices = @transform_5, window_bounds = array<i64: 1, 16, 128>}, {pipeline_mode = #tpu.pipeline_mode<synchronous>, transform_indices = @transform_6, window_bounds = array<i64: 8, 128>}, {pipeline_mode = #tpu.pipeline_mode<synchronous>, transform_indices = @transform_7, window_bounds = array<i64: 8, 128>}]} {
    %c0_i32 = arith.constant 0 : i32
    %0 = arith.cmpi eq, %arg0, %c0_i32 : i32
    %1 = arith.extui %0 : i1 to i32
    %c0_i32_0 = arith.constant 0 : i32
    %2 = arith.cmpi ne, %1, %c0_i32_0 : i32
    scf.if %2 {
      %c0_28 = arith.constant 0 : index
      %c0_29 = arith.constant 0 : index
      %64 = vector.load %arg3[%c0_28, %c0_29] : memref<8x128xf32, #tpu.memory_space<vmem>>, vector<8x128xf32>
      %c0_30 = arith.constant 0 : index
      %c0_31 = arith.constant 0 : index
      %65 = vector.load %arg7[%c0_30, %c0_31] : memref<8x128xf32, #tpu.memory_space<vmem>>, vector<8x128xf32>
      tpu.vector_store %arg7[%c0_30, %c0_31], %64 {strides = array<i32>} : memref<8x128xf32, #tpu.memory_space<vmem>>, vector<8x128xf32>,
      %c0_32 = arith.constant 0 : index
      %c0_33 = arith.constant 0 : index
      %66 = vector.load %arg4[%c0_32, %c0_33] : memref<8x128xf32, #tpu.memory_space<vmem>>, vector<8x128xf32>
      %c0_34 = arith.constant 0 : index
      %c0_35 = arith.constant 0 : index
      %67 = vector.load %arg8[%c0_34, %c0_35] : memref<8x128xf32, #tpu.memory_space<vmem>>, vector<8x128xf32>
      tpu.vector_store %arg8[%c0_34, %c0_35], %66 {strides = array<i32>} : memref<8x128xf32, #tpu.memory_space<vmem>>, vector<8x128xf32>,
    } else {
    }
    %3 = arith.index_cast %arg0 : i32 to index
    %4 = memref.load %arg1[%3] : memref<4xf32, #tpu.memory_space<smem>>
    %c0 = arith.constant 0 : index
    %c0_1 = arith.constant 0 : index
    %c0_2 = arith.constant 0 : index
    %5 = vector.load %arg2[%c0, %c0_1, %c0_2] : memref<1x1x128xf32, #tpu.memory_space<vmem>>, vector<1x1x128xf32>
    %6 = vector.shape_cast %5 : vector<1x1x128xf32> to vector<1x128xf32>
    %c0_3 = arith.constant 0 : index
    %c0_4 = arith.constant 0 : index
    %7 = vector.load %arg7[%c0_3, %c0_4] : memref<8x128xf32, #tpu.memory_space<vmem>>, vector<8x128xf32>
    %c0_5 = arith.constant 0 : index
    %c0_6 = arith.constant 0 : index
    %8 = vector.load %arg8[%c0_5, %c0_6] : memref<8x128xf32, #tpu.memory_space<vmem>>, vector<8x128xf32>
    %c0_7 = arith.constant 0 : index
    %c0_8 = arith.constant 0 : index
    %9 = vector.load %arg5[%c0_7, %c0_8] : memref<80x8xf32, #tpu.memory_space<vmem>>, vector<32x8xf32>
    %c32 = arith.constant 32 : index
    %c0_9 = arith.constant 0 : index
    %10 = vector.load %arg5[%c32, %c0_9] : memref<80x8xf32, #tpu.memory_space<vmem>>, vector<16x8xf32>
    %c48 = arith.constant 48 : index
    %c0_10 = arith.constant 0 : index
    %11 = vector.load %arg5[%c48, %c0_10] : memref<80x8xf32, #tpu.memory_space<vmem>>, vector<32x3xf32>
    %12 = vector.extract_strided_slice %11 {offsets = [0, 0], sizes = [32, 1], strides = [1, 1]} : vector<32x3xf32> to vector<32x1xf32>
    %13 = vector.extract_strided_slice %11 {offsets = [0, 1], sizes = [32, 1], strides = [1, 1]} : vector<32x3xf32> to vector<32x1xf32>
    %14 = vector.extract_strided_slice %11 {offsets = [0, 2], sizes = [32, 1], strides = [1, 1]} : vector<32x3xf32> to vector<32x1xf32>
    %cst = arith.constant dense<0.000000e+00> : vector<32x128xf32>
    %15 = tpu.matmul %9, %7, %cst {dimension_numbers = #tpu.dot_dimension_numbers<[1], [0], [0], [1], [0, 0, 1, 1], [], []>} : vector<32x8xf32>, vector<8x128xf32>, vector<32x128xf32> -> vector<32x128xf32>
    %16 = vector.broadcast %12 : vector<32x1xf32> to vector<32x128xf32>
    %17 = vector.broadcast %6 : vector<1x128xf32> to vector<32x128xf32>
    %18 = arith.mulf %16, %17 : vector<32x128xf32>
    %19 = arith.addf %15, %18 : vector<32x128xf32>
    %20 = vector.broadcast %4 : f32 to vector<32x1xf32>
    %21 = arith.mulf %13, %20 : vector<32x1xf32>
    %22 = vector.broadcast %21 : vector<32x1xf32> to vector<32x128xf32>
    %23 = arith.addf %19, %22 : vector<32x128xf32>
    %24 = vector.broadcast %14 : vector<32x1xf32> to vector<32x128xf32>
    %25 = arith.addf %23, %24 : vector<32x128xf32>
    %26 = vector.extract_strided_slice %25 {offsets = [0, 0], sizes = [8, 128], strides = [1, 1]} : vector<32x128xf32> to vector<8x128xf32>
    %cst_11 = arith.constant 5.000000e-01 : f32
    %27 = vector.broadcast %cst_11 : f32 to vector<8x128xf32>
    %28 = arith.mulf %27, %26 : vector<8x128xf32>
    %29 = math.tanh %28 : vector<8x128xf32>
    %cst_12 = arith.constant 5.000000e-01 : f32
    %30 = vector.broadcast %cst_12 : f32 to vector<8x128xf32>
    %31 = arith.mulf %30, %29 : vector<8x128xf32>
    %cst_13 = arith.constant 5.000000e-01 : f32
    %32 = vector.broadcast %cst_13 : f32 to vector<8x128xf32>
    %33 = arith.addf %31, %32 : vector<8x128xf32>
    %34 = vector.extract_strided_slice %25 {offsets = [8, 0], sizes = [8, 128], strides = [1, 1]} : vector<32x128xf32> to vector<8x128xf32>
    %cst_14 = arith.constant 5.000000e-01 : f32
    %35 = vector.broadcast %cst_14 : f32 to vector<8x128xf32>
    %36 = arith.mulf %35, %34 : vector<8x128xf32>
    %37 = math.tanh %36 : vector<8x128xf32>
    %cst_15 = arith.constant 5.000000e-01 : f32
    %38 = vector.broadcast %cst_15 : f32 to vector<8x128xf32>
    %39 = arith.mulf %38, %37 : vector<8x128xf32>
    %cst_16 = arith.constant 5.000000e-01 : f32
    %40 = vector.broadcast %cst_16 : f32 to vector<8x128xf32>
    %41 = arith.addf %39, %40 : vector<8x128xf32>
    %42 = vector.extract_strided_slice %25 {offsets = [16, 0], sizes = [8, 128], strides = [1, 1]} : vector<32x128xf32> to vector<8x128xf32>
    %43 = math.tanh %42 : vector<8x128xf32>
    %44 = vector.extract_strided_slice %25 {offsets = [24, 0], sizes = [8, 128], strides = [1, 1]} : vector<32x128xf32> to vector<8x128xf32>
    %cst_17 = arith.constant 5.000000e-01 : f32
    %45 = vector.broadcast %cst_17 : f32 to vector<8x128xf32>
    %46 = arith.mulf %45, %44 : vector<8x128xf32>
    %47 = math.tanh %46 : vector<8x128xf32>
    %cst_18 = arith.constant 5.000000e-01 : f32
    %48 = vector.broadcast %cst_18 : f32 to vector<8x128xf32>
    %49 = arith.mulf %48, %47 : vector<8x128xf32>
    %cst_19 = arith.constant 5.000000e-01 : f32
    %50 = vector.broadcast %cst_19 : f32 to vector<8x128xf32>
    %51 = arith.addf %49, %50 : vector<8x128xf32>
    %52 = arith.mulf %41, %8 : vector<8x128xf32>
    %53 = arith.mulf %33, %43 : vector<8x128xf32>
    %54 = arith.addf %52, %53 : vector<8x128xf32>
    %55 = math.tanh %54 : vector<8x128xf32>
    %56 = arith.mulf %51, %55 : vector<8x128xf32>
    %cst_20 = arith.constant dense<0.000000e+00> : vector<16x128xf32>
    %57 = tpu.matmul %10, %56, %cst_20 {dimension_numbers = #tpu.dot_dimension_numbers<[1], [0], [0], [1], [0, 0, 1, 1], [], []>} : vector<16x8xf32>, vector<8x128xf32>, vector<16x128xf32> -> vector<16x128xf32>
    %58 = math.tanh %57 : vector<16x128xf32>
    %c0_21 = arith.constant 0 : index
    %c0_22 = arith.constant 0 : index
    %c0_23 = arith.constant 0 : index
    %59 = vector.load %arg6[%c0_21, %c0_22, %c0_23] : memref<1x16x128xf32, #tpu.memory_space<vmem>>, vector<1x16x128xf32>
    %60 = vector.shape_cast %59 : vector<1x16x128xf32> to vector<16x128xf32>
    %61 = vector.shape_cast %58 : vector<16x128xf32> to vector<1x16x128xf32>
    tpu.vector_store %arg6[%c0_21, %c0_22, %c0_23], %61 {strides = array<i32>} : memref<1x16x128xf32, #tpu.memory_space<vmem>>, vector<1x16x128xf32>,
    %c0_24 = arith.constant 0 : index
    %c0_25 = arith.constant 0 : index
    %62 = vector.load %arg7[%c0_24, %c0_25] : memref<8x128xf32, #tpu.memory_space<vmem>>, vector<8x128xf32>
    tpu.vector_store %arg7[%c0_24, %c0_25], %56 {strides = array<i32>} : memref<8x128xf32, #tpu.memory_space<vmem>>, vector<8x128xf32>,
    %c0_26 = arith.constant 0 : index
    %c0_27 = arith.constant 0 : index
    %63 = vector.load %arg8[%c0_26, %c0_27] : memref<8x128xf32, #tpu.memory_space<vmem>>, vector<8x128xf32>
    tpu.vector_store %arg8[%c0_26, %c0_27], %54 {strides = array<i32>} : memref<8x128xf32, #tpu.memory_space<vmem>>, vector<8x128xf32>,
    return
  }
  func.func @transform_0(%arg0: i32) -> i32 {
    %c0_i32 = arith.constant 0 : i32
    %c0_i32_0 = arith.constant 0 : i32
    return %c0_i32 : i32
  }
  func.func @transform_1(%arg0: i32) -> (i32, i32, i32) {
    %c0_i32 = arith.constant 0 : i32
    %c0_i32_0 = arith.constant 0 : i32
    %c0_i32_1 = arith.constant 0 : i32
    return %arg0, %c0_i32, %c0_i32_0 : i32, i32, i32
  }
  func.func @transform_2(%arg0: i32) -> (i32, i32) {
    %c0_i32 = arith.constant 0 : i32
    %c0_i32_0 = arith.constant 0 : i32
    %c0_i32_1 = arith.constant 0 : i32
    return %c0_i32, %c0_i32_0 : i32, i32
  }
  func.func @transform_3(%arg0: i32) -> (i32, i32) {
    %c0_i32 = arith.constant 0 : i32
    %c0_i32_0 = arith.constant 0 : i32
    %c0_i32_1 = arith.constant 0 : i32
    return %c0_i32, %c0_i32_0 : i32, i32
  }
  func.func @transform_4(%arg0: i32) -> (i32, i32) {
    %c0_i32 = arith.constant 0 : i32
    %c0_i32_0 = arith.constant 0 : i32
    %c0_i32_1 = arith.constant 0 : i32
    return %c0_i32, %c0_i32_0 : i32, i32
  }
  func.func @transform_5(%arg0: i32) -> (i32, i32, i32) {
    %c0_i32 = arith.constant 0 : i32
    %c0_i32_0 = arith.constant 0 : i32
    %c0_i32_1 = arith.constant 0 : i32
    return %arg0, %c0_i32, %c0_i32_0 : i32, i32, i32
  }
  func.func @transform_6(%arg0: i32) -> (i32, i32) {
    %c0_i32 = arith.constant 0 : i32
    %c0_i32_0 = arith.constant 0 : i32
    %c0_i32_1 = arith.constant 0 : i32
    return %c0_i32, %c0_i32_0 : i32, i32
  }
  func.func @transform_7(%arg0: i32) -> (i32, i32) {
    %c0_i32 = arith.constant 0 : i32
    %c0_i32_0 = arith.constant 0 : i32
    %c0_i32_1 = arith.constant 0 : i32
    return %c0_i32, %c0_i32_0 : i32, i32
  }
}

</mosaic_0001>

<bundles_post_ra>
// kernel: attention_neuron_rollout.1
= control target key start
LH: loop header
LB: loop body
LE: loop exit
PB: predicated region body
PF: predicated region fallthrough
CT: control target
= control target key end

     0   :  { %13 = vsyncpa [#allocation3], 0  ;;  %s819_s24 = smov 0   ;;  %s935_s0 = inlined_call_operand.vmem [shape: f32[4], index: 0, kind: input, shape index: {}]   ;;  %s936_s1 = inlined_call_operand.vmem [shape: f32[4,1,128], index: 1, kind: input, shape index: {}]   ;;  %s937_s2 = inlined_call_operand.vmem [shape: f32[8,128], index: 2, kind: input, shape index: {}, may-alias: {2,6}]   ;;  %s938_s3 = inlined_call_operand.vmem [shape: f32[8,128], index: 3, kind: input, shape index: {}, may-alias: {3,7}]   ;;  %s939_s4 = inlined_call_operand.vmem [shape: f32[80,8], index: 4, kind: input, shape index: {}]   ;;  %s940_s5 = inlined_call_operand.vmem [shape: f32[4,16,128], index: 5, kind: output, shape index: {0}]   ;;  %s941_s6 = inlined_call_operand.vmem [shape: f32[8,128], index: 6, kind: output, shape index: {1}, may-alias: {2,6}]   ;;  %s942_s7 = inlined_call_operand.vmem [shape: f32[8,128], index: 7, kind: output, shape index: {2}, may-alias: {3,7}]  }
   0x1 LB: > { %s825_s25 = sadd.s32 4294967295, %s773_s24   ;;  %p664_p0 = scmp.ge.s32.totalorder %s773_s24, 1  ;;  %s773_s24 = sphi %s819_s24, %s19_s24  }
   0x2   : > { %p202_p1 = scmp.lt.s32.totalorder %s773_s24, 5  ;;  %s215_s28 = sshll.u32 %s935_s0, 4  ;;  %s216_s28 = int_to_ptr.vmem [resolvable:$true] %s215_s28 }
   0x3   : > { %p711_p4 = scmp.eq.s32.totalorder %s825_s25, 0  ;;  %s748_s30 = scalar_lea.vmem %s216_s28, 16 }
   0x4   : > { %p833_p3 = pnand %p664_p0, %p202_p1  ;;  %p749_p7 = scmp.ne.s32.totalorder %s216_s28, %s748_s30 }
   0x5   : > { %p756_p11 = scmp.lt.s32.totalorder %s216_s28, %s216_s28  ;;  %p757_p12 = scmp.lt.s32.totalorder %s748_s30, %s748_s30 }
   0x6   : > { %p707_p5 = pneg %p833_p3 }
   0x7   : > { %p758_p13 = por %p757_p12, %p756_p11 }
   0x8   : > { %p708_p6 = pnand %p711_p4, %p707_p5 }
   0xa   : > { %p750_p8 = pneg %p708_p6 }
   0xc   : > { %p751_p9 = pnand %p750_p8, %p749_p7 }
   0xe   : > { %p752_p10 = pneg %p751_p9 }
  0x10   : > { %p759_p2 = pnand %p758_p13, %p752_p10 }
  0x12   : > { %762 = shalt.err (!%p759_p2)
}
  0x13   : > { %s775_s8 = smov [#allocation2]   ;;  %243 = sbr.rel (%p833_p3) target bundleno = 522 (0x20a), region = 40 }
  0x14   : > { %710 = dma.vmem_to_smem (!%p708_p6), %s216_s28, 16, %s775_s8, [#allocation3]  }
  0x1a   : > { %768 = dma.done.wait (%p711_p4), [#allocation3], 16  }
  0x1b   : > { %770 = vsyncadd (%p711_p4), [#allocation3], 4294967280 }
  0x1c   : > { %249 = sfence }
  0x1d   : > { %p274_p0 = scmp.lt.s32.totalorder %s825_s25, 3  ;;  %p944_p1 = scmp.ne.s32.totalorder %s825_s25, 0 }
  0x1e   : > { %v286_v0 = vld [vmem:[%s937_s2] sm:$0xff] (!%p944_p1) }
  0x1f   : > { %s850_s9 = scalar_select %p274_p0, %s825_s25, 3 }
  0x20   : > { %285 = sbr.rel (%p944_p1) target bundleno = 39 (0x27), region = 48  ;;  %v288_v1 = vld [vmem:[%s938_s3] sm:$0xff] (!%p944_p1)  ;;  %287 = vst [vmem:[%s941_s6] sm:$0xff] (!%p944_p1), %v286_v0 }
  0x21   : > { %s276_s12 = scalar_lea.vmem %s936_s1, %s850_s9  ;;  %s681_s13 = sshll.u32 %s850_s9, 4  ;;  %289 = vst [vmem:[%s942_s7] sm:$0xff] (!%p944_p1), %v288_v1 }
  0x22   : > { %s860_s16 = scalar_lea.vmem %s940_s5, %s681_s13 }
  0x27 PF: > { %v292_v2 = vld [vmem:[%s941_s6] sm:$0xff]  ;;  %vm334_vm0 = vcmask 64512   ;;  %v295_v4 = vld [vmem:[%s939_s4 + $0x8] sm:$0xff]  ;;  %v296_v5 = vld [vmem:[%s939_s4 + $0x10] sm:$0xff]  ;;  %s290_s17 = sld [smem:[#allocation2 + %s825_s25]]  ;;  %v776_v7 = vmov 2  }
  0x28   : > { %v294_v3 = vld [vmem:[%s939_s4] sm:$0xff]  ;;  %690 = vmatprep.subr.mxu0 %v292_v2  ;;  %v300_v6 = vld [vmem:[%s939_s4 + $0x30] sm:$0xff]  ;;  %726 = vset.pattern.permute.xlu1 %v776_v7  ;;  %v297_v8 = vld [vmem:[%s939_s4 + $0x18] sm:$0xff]  ;;  %v777_v9 = vmov 0   ;;  %v778_v11 = vmov 1  }
  0x29   : > { %692 = vmatprep.mubr.msk.f32.mxu0 %vm334_vm0, %v294_v3  ;;  %691 = vmatpush3.msra.mxu0 %v292_v2  ;;  %v301_v10 = vld [vmem:[%s939_s4 + $0x38] sm:$0xff]  ;;  %v302_v15 = vld [vmem:[%s939_s4 + $0x40] sm:$0xff]  ;;  %v303_v17 = vld [vmem:[%s939_s4 + $0x48] sm:$0xff] }
  0x2a   : > { %693 = vmatmul.mubr.msk.f32.vlgmr.msra.gmra.mrb[0].mxu0 %vm334_vm0, %v295_v4  ;;  %462 = vperm.xlu1 %726, %v300_v6   ;;  %v298_v19 = vld [vmem:[%s939_s4 + $0x20] sm:$0xff] }
  0x2b   : > { %695 = vmatprep.mubr.msk.f32.mxu0 %vm334_vm0, %v296_v5  ;;  %725 = vset.pattern.permute.xlu0 %v777_v9  ;;  %v672_v28 = vld [vmem:[%s276_s12] ss:$0 sm:$0xff] }
  0x2c   : > { %306 = vperm.xlu0 %725, %v300_v6   ;;  %700 = vmatprep.mubr.msk.f32.mxu1 %vm334_vm0, %v298_v19  ;;  %v293_v59 = vld [vmem:[%s942_s7] sm:$0xff] }
  0x2d   : > { %v432_v12 = vstv %s290_s17 }
  0x2e   : > { %696 = vmatmul.mubr.msk.f32.gmra.mrb[2].mxu0 %vm334_vm0, %v297_v8  ;;  %728 = vset.pattern.permute.xlu1 %v778_v11  ;;  %v433_v13 = vmul.f32 %v432_v12, %v300_v6  ;;  %v434_v14 = vmul.f32 %v432_v12, %v301_v10  ;;  %v435_v16 = vmul.f32 %v432_v12, %v302_v15  ;;  %v299_v8 = vld [vmem:[%s939_s4 + $0x28] sm:$0xff] }
  0x2f   : > { %v436_v18 = vmul.f32 %v432_v12, %v303_v17 }
  0x30   : > { %311 = vperm.xlu0 %725, %v301_v10   ;;  %439 = vperm.xlu1 %728, %v433_v13  }
  0x34   : > { %316 = vperm.xlu0 %725, %v302_v15   ;;  %444 = vperm.xlu1 %728, %v434_v14  }
  0x38   : > { %727 = vset.pattern.permute.xlu0 %v776_v7  ;;  %449 = vperm.xlu1 %728, %v435_v16  }
  0x39   : > { %466 = vperm.xlu0 %727, %v301_v10  }
  0x3c   : > { %729 = vset.pattern.permute.xlu1 %v776_v7 }
  0x3d   : > { %730 = vset.pattern.permute.xlu0 %v777_v9  ;;  %470 = vperm.xlu1 %729, %v302_v15  }
  0x3e   : > { %321 = vperm.xlu0 %730, %v303_v17  }
  0x41   : > { %731 = vset.pattern.permute.xlu1 %v778_v11 }
  0x42   : > { %733 = vset.pattern.permute.xlu0 %v776_v7  ;;  %454 = vperm.xlu1 %731, %v436_v18  }
  0x46   : > { %732 = vset.pattern.permute.xlu1 %v776_v7 }
  0x47   : > { %474 = vperm.xlu1 %732, %v303_v17  }
  0xa9   : > { %v463_v20 = vpop.permute.xlu1 %462 }
  0xab   : > { %v307_v21 = vpop.permute.xlu0 %306 }
  0xac   : > { %v330_v32 = vmul.f32 %v672_v28, %v307_v21 }
  0xaf   : > { %v440_v22 = vpop.permute.xlu1 %439  ;;  %v312_v23 = vpop.permute.xlu0 %311 }
  0xb0   : > { %v331_v31 = vmul.f32 %v672_v28, %v312_v23 }
  0xb3   : > { %v445_v24 = vpop.permute.xlu1 %444  ;;  %v317_v25 = vpop.permute.xlu0 %316 }
  0xb4   : > { %v332_v39 = vmul.f32 %v672_v28, %v317_v25 }
  0xb7   : > { %v450_v26 = vpop.permute.xlu1 %449 }
  0xb8   : > { %v467_v27 = vpop.permute.xlu0 %466 }
  0xbc   : > { %v471_v29 = vpop.permute.xlu1 %470 }
  0xbd   : > { %v322_v30 = vpop.permute.xlu0 %321 }
  0xbe   : > { %v333_v36 = vmul.f32 %v672_v28, %v322_v30 }
  0xc1   : > { %v455_v42 = vpop.permute.xlu1 %454 }
  0xc6   : > { %v475_v53 = vpop.permute.xlu1 %474 }
  0xfd   : > { %v694_v33 = vpop.f32.mrb[0].mxu0 }
  0xfe   : > { %v419_v34 = vadd.f32 %v694_v33, %v331_v31  ;;  %v413_v35 = vpop.f32.mrb[1].mxu0 }
  0xff   : > { %v414_v37 = vadd.f32 %v413_v35, %v330_v32 }
 0x100   : > { %v458_v38 = vadd.f32 %v445_v24, %v419_v34 }
 0x101   : > { %v457_v40 = vadd.f32 %v440_v22, %v414_v37  ;;  %v697_v41 = vpop.f32.mrb[2].mxu0 }
 0x102   : > { %v478_v43 = vadd.f32 %v467_v27, %v458_v38  ;;  %v429_v44 = vadd.f32 %v697_v41, %v333_v36  ;;  %v423_v45 = vpop.f32.mrb[3].mxu0 }
 0x103   : > { %v477_v46 = vadd.f32 %v463_v20, %v457_v40  ;;  %v424_v47 = vadd.f32 %v423_v45, %v332_v39 }
 0x104   : > { %v485_v48 = vmul.f32 0.5, %v478_v43  ;;  %v460_v51 = vadd.f32 %v455_v42, %v429_v44 }
 0x105   : > { %v481_v49 = vmul.f32 0.5, %v477_v46  ;;  %v459_v50 = vadd.f32 %v450_v26, %v424_v47 }
 0x106   : > { %734 = vtanh.f32 %v485_v48  ;;  %v480_v54 = vadd.f32 %v475_v53, %v460_v51 }
 0x107   : > { %736 = vtanh.f32 %v481_v49  ;;  %v479_v52 = vadd.f32 %v471_v29, %v459_v50 }
 0x108   : > { %v490_v55 = vmul.f32 0.5, %v480_v54 }
 0x109   : > { %738 = vtanh.f32 %v479_v52 }
 0x10a   : > { %740 = vtanh.f32 %v490_v55 }
 0x110   : > { %v735_v56 = vpop.eup %734 }
 0x111   : > { %v737_v57 = vpop.eup %736  ;;  %v487_v58 = vmul.f32 0.5, %v735_v56 }
 0x112   : > { %v483_v60 = vmul.f32 0.5, %v737_v57 }
 0x113   : > { %v488_v61 = vadd.f32 0.5, %v487_v58  ;;  %v739_v63 = vpop.eup %738 }
 0x114   : > { %v484_v62 = vadd.f32 0.5, %v483_v60  ;;  %v741_v3 = vpop.eup %740 }
 0x115   : > { %v494_v0 = vmul.f32 %v488_v61, %v293_v59  ;;  %v492_v4 = vmul.f32 0.5, %v741_v3 }
 0x116   : > { %v495_v1 = vmul.f32 %v739_v63, %v484_v62 }
 0x117   : > { %v493_v5 = vadd.f32 0.5, %v492_v4 }
 0x118   : > { %v496_v2 = vadd.f32 %v495_v1, %v494_v0 }
 0x11a   : > { %742 = vtanh.f32 %v496_v2  ;;  %585 = vst [vmem:[%s942_s7] sm:$0xff] %v496_v2 }
 0x124   : > { %v743_v6 = vpop.eup %742 }
 0x125   : > { %v498_v7 = vmul.f32 %v743_v6, %v493_v5 }
 0x127   : > { %698 = vmatprep.subr.mxu1 %v498_v7  ;;  %584 = vst [vmem:[%s941_s6] sm:$0xff] %v498_v7 }
 0x128   : > { %699 = vmatpush3.msra.mxu1 %v498_v7 }
 0x129   : > { %701 = vmatmul.mubr.msk.f32.vlgmr.msra.gmra.mrb[0].mxu1 %vm334_vm0, %v299_v8 }
 0x1fc   : > { %v702_v9 = vpop.f32.mrb[0].mxu1 }
 0x1fd   : > { %744 = vtanh.f32 %v702_v9  ;;  %v571_v10 = vpop.f32.mrb[1].mxu1 }
 0x1fe   : > { %746 = vtanh.f32 %v571_v10 }
 0x207   : > { %v745_v11 = vpop.eup %744 }
 0x208   : > { %v747_v12 = vpop.eup %746  ;;  %583 = vst [vmem:[%s860_s16 + $0x8] sm:$0xff] %v745_v11 }
 0x209   : > { %582 = vst [vmem:[%s860_s16] sm:$0xff] %v747_v12 }
 0x20a PF: > { %s19_s24 = sadd.s32 1, %s773_s24  }
 0x20b   : > { %p16_p2 = scmp.ge.s32.totalorder %s19_s24, 6  }
 0x20d   :  { %18 = sbr.rel (!%p16_p2) target bundleno = 1 (0x1), region = 95 }
 0x214   :  { %619 = vsyncpa [#allocation3], 1 }
 0x215   :  { %621 = vsyncpa [#allocation3 + $0x1], 1 }

</bundles_post_ra>
